<compile_context>
chip_gen: v7x
topology: tpu7x:2x2x1
jax: 0.10.0
libtpu: 0.0.40
codegen_flags: <defaults>
</compile_context>

<pallas_src>
import functools

import jax
import jax.numpy as jnp
from jax.experimental import pallas as pl
from jax.experimental.pallas import tpu as pltpu


def _leaky_relu(x, slope=0.2):
    return jnp.where(x > 0, x, slope * x)


def _round_up(x, m):
    return (x + m - 1) // m * m


def encoder_kernel(y_ref,
                   w1_ref, b1_ref,
                   w2_ref, b2_ref,
                   w3_ref, b3_ref,
                   wh_ref, bh_ref,
                   out_ref, *, precision=None):
    """One batch tile: 4 MXU matmuls + f32 epilogue (bias add + LeakyReLU)."""
    cdt = w1_ref.dtype                    # matmul operand dtype (f32 or bf16)
    h = y_ref[...].astype(cdt)

    h = _leaky_relu(
        jnp.dot(h, w1_ref[...], preferred_element_type=jnp.float32,
                precision=precision) + b1_ref[...])
    h = _leaky_relu(
        jnp.dot(h.astype(cdt), w2_ref[...], preferred_element_type=jnp.float32,
                precision=precision) + b2_ref[...])
    h = _leaky_relu(
        jnp.dot(h.astype(cdt), w3_ref[...], preferred_element_type=jnp.float32,
                precision=precision) + b3_ref[...])

    # Fused (means | log_vars) head: one MXU pass, narrow f32 store.
    out = jnp.dot(h.astype(cdt), wh_ref[...], preferred_element_type=jnp.float32,
                  precision=precision) + bh_ref[...]
    out_ref[...] = out.astype(out_ref.dtype)


def prepare_encoder_params(params, compute_dtype=jnp.float32):
    """One-time parameter prep (call OUTSIDE the per-step hot path).

    * Fuses FC_means / FC_log_vars into a single head weight/bias.
    * Casts matmul operands to `compute_dtype` (bf16 recommended on v6e/v7x:
      ~3x fewer MXU passes, half the weight/activation DMA bytes).
    * Biases stay f32: bias-add and LeakyReLU run in f32 inside the kernel.
    """
    cdt = jnp.dtype(compute_dtype)
    head_w = jnp.concatenate([params["wm"], params["wlv"]], axis=1)   # (hid, 2*latent)
    head_b = jnp.concatenate([params["bm"], params["blv"]], axis=1)   # (1,  2*latent)
    return dict(
        w1=params["w1"].astype(cdt), b1=params["b1"].astype(jnp.float32),
        w2=params["w2"].astype(cdt), b2=params["b2"].astype(jnp.float32),
        w3=params["w3"].astype(cdt), b3=params["b3"].astype(jnp.float32),
        wh=head_w.astype(cdt),       bh=head_b.astype(jnp.float32),
    )


def encoder_forward(y, prepped, *, tile_b=512, precision=None):
    """y: (B, signal_dim) f32.  prepped: output of prepare_encoder_params."""
    B, signal_dim = y.shape
    hidden_dim = prepped["w1"].shape[1]
    head_out = prepped["wh"].shape[1]          # 2 * latent_dim
    latent_dim = head_out // 2

    # Pad the batch only to the sublane multiple (<= 7 rows).  The last grid
    # tile may be ragged (pl.cdiv): OOB tail rows are unspecified but stay
    # row-local through the matmuls and are sliced off below.
    b8 = _round_up(B, 8)
    y_p = jnp.pad(y, ((0, b8 - B), (0, 0))) if b8 != B else y

    # Large tiles amortize the ~0.35 us per-grid-step overhead; cap so there
    # are >= 2 grid steps whenever possible, letting the "parallel" batch axis
    # shard tiles across both v7x TensorCores (harmless on v5e/v6e).
    tb = min(tile_b, max(8, _round_up(-(-b8 // 2), 8)))
    grid = (pl.cdiv(b8, tb),)

    def resident(arr):
        # Whole weight/bias, same block every grid step -> stays resident in
        # VMEM.  (At these sizes default double-buffering costs < 100 KiB, so
        # no single-buffer pipeline tuning is needed.)
        return pl.BlockSpec(arr.shape, lambda i: (0,) * arr.ndim)

    # Footprint-derived VMEM limit (double-buffered streamed tiles + resident
    # params + h slabs), with generous headroom but well under v7x's 64 MiB.
    nbytes = lambda a: a.size * a.dtype.itemsize
    weight_bytes = sum(nbytes(prepped[k]) for k in
                       ("w1", "b1", "w2", "b2", "w3", "b3", "wh", "bh"))
    tile_bytes = tb * (signal_dim * y.dtype.itemsize + head_out * 4)
    h_bytes = tb * hidden_dim * 4
    footprint = 2 * weight_bytes + 2 * tile_bytes + 4 * h_bytes
    vmem_limit = int(min(max(2 * footprint, 8 << 20), 32 << 20))

    flops = 2 * b8 * (signal_dim * hidden_dim
                      + 2 * hidden_dim * hidden_dim
                      + hidden_dim * head_out)
    bytes_accessed = (b8 * signal_dim * y.dtype.itemsize     # activations in
                      + b8 * head_out * 4                    # fused head out
                      + weight_bytes)                        # resident params

    kernel = functools.partial(encoder_kernel, precision=precision)

    fused = pl.pallas_call(
        kernel,
        out_shape=jax.ShapeDtypeStruct((b8, head_out), jnp.float32),
        grid=grid,
        in_specs=[
            pl.BlockSpec((tb, signal_dim), lambda i: (i, 0)),   # batch-tiled
            resident(prepped["w1"]), resident(prepped["b1"]),
            resident(prepped["w2"]), resident(prepped["b2"]),
            resident(prepped["w3"]), resident(prepped["b3"]),
            resident(prepped["wh"]), resident(prepped["bh"]),
        ],
        out_specs=pl.BlockSpec((tb, head_out), lambda i: (i, 0)),
        compiler_params=pltpu.CompilerParams(
            dimension_semantics=("parallel",),
            vmem_limit_bytes=vmem_limit,
        ),
        cost_estimate=pl.CostEstimate(
            flops=flops, transcendentals=0, bytes_accessed=bytes_accessed),
    )(y_p,
      prepped["w1"], prepped["b1"],
      prepped["w2"], prepped["b2"],
      prepped["w3"], prepped["b3"],
      prepped["wh"], prepped["bh"])

    means = fused[:B, :latent_dim]
    log_vars = fused[:B, latent_dim:]
    return means, log_vars


def init_params(key, signal_dim, hidden_dim, latent_dim):
    """Deterministic synthetic init; weights stored as (in, out)."""
    ks = jax.random.split(key, 10)

    def lin(kw, kb, fan_in, fan_out):
        # PyTorch-style uniform(-1/sqrt(fan_in), 1/sqrt(fan_in))
        bound = 1.0 / jnp.sqrt(jnp.float32(fan_in))
        w = jax.random.uniform(kw, (fan_in, fan_out), jnp.float32, -bound, bound)
        b = jax.random.uniform(kb, (1, fan_out), jnp.float32, -bound, bound)
        return w, b

    w1, b1 = lin(ks[0], ks[1], signal_dim, hidden_dim)
    w2, b2 = lin(ks[2], ks[3], hidden_dim, hidden_dim)
    w3, b3 = lin(ks[4], ks[5], hidden_dim, hidden_dim)
    wm, bm = lin(ks[6], ks[7], hidden_dim, latent_dim)
    wlv, blv = lin(ks[8], ks[9], hidden_dim, latent_dim)

    return dict(w1=w1, b1=b1, w2=w2, b2=b2, w3=w3, b3=b3,
                wm=wm, bm=bm, wlv=wlv, blv=blv)


def reference_forward(y, p):
    def leaky(x):
        return jnp.where(x > 0, x, 0.2 * x)
    h = leaky(y @ p["w1"] + p["b1"])
    h = leaky(h @ p["w2"] + p["b2"])
    h = leaky(h @ p["w3"] + p["b3"])
    return h @ p["wm"] + p["bm"], h @ p["wlv"] + p["blv"]


if __name__ == "__main__":
    # Small shapes consistent with the module's forward.
    batch = 8
    signal_dim = 16
    hidden_dim = 32
    latent_dim = 8

    key = jax.random.PRNGKey(0)
    k_y, k_y2, k_p = jax.random.split(key, 3)

    y = jax.random.normal(k_y, (batch, signal_dim), jnp.float32)
    params = init_params(k_p, signal_dim, hidden_dim, latent_dim)

    fwd = jax.jit(encoder_forward)

    # ---- strict f32 path -------------------------------------------------
    prepped_f32 = prepare_encoder_params(params, jnp.float32)
    means, log_vars = fwd(y, prepped_f32)
    jax.block_until_ready((means, log_vars))

    ref_means, ref_log_vars = reference_forward(y, params)
    assert means.shape == (batch, latent_dim)
    assert log_vars.shape == (batch, latent_dim)
    assert jnp.allclose(means, ref_means, atol=1e-5, rtol=1e-5)
    assert jnp.allclose(log_vars, ref_log_vars, atol=1e-5, rtol=1e-5)

    # ---- ragged multi-tile batch (exercises >=2 grid steps + OOB tail) ----
    batch2 = 20                       # b8=24, tb=16 -> grid=(2,), ragged tail
    y2 = jax.random.normal(k_y2, (batch2, signal_dim), jnp.float32)
    m2, lv2 = fwd(y2, prepped_f32)
    jax.block_until_ready((m2, lv2))
    rm2, rlv2 = reference_forward(y2, params)
    assert jnp.allclose(m2, rm2, atol=1e-5, rtol=1e-5)
    assert jnp.allclose(lv2, rlv2, atol=1e-5, rtol=1e-5)

    # ---- bf16 MXU-operand path (v6e/v7x win), f32 epilogue, looser tol ----
    prepped_bf16 = prepare_encoder_params(params, jnp.bfloat16)
    mb, lvb = fwd(y, prepped_bf16)
    jax.block_until_ready((mb, lvb))
    assert jnp.allclose(mb, ref_means, atol=5e-2, rtol=5e-2)
    assert jnp.allclose(lvb, ref_log_vars, atol=5e-2, rtol=5e-2)

    # TODO(synk): `reparameterization` (sampling) is not part of forward(); not implemented here.
    print("KERNEL_OK")
</pallas_src>

<mosaic_0001>
module attributes {stable_mosaic.version = 11 : i64} {
  func.func @encoder_kernel(%arg0: i32, %arg1: memref<8x16xf32, #tpu.memory_space<vmem>>, %arg2: memref<16x32xf32, #tpu.memory_space<vmem>>, %arg3: memref<1x32xf32, #tpu.memory_space<vmem>>, %arg4: memref<32x32xf32, #tpu.memory_space<vmem>>, %arg5: memref<1x32xf32, #tpu.memory_space<vmem>>, %arg6: memref<32x32xf32, #tpu.memory_space<vmem>>, %arg7: memref<1x32xf32, #tpu.memory_space<vmem>>, %arg8: memref<32x16xf32, #tpu.memory_space<vmem>>, %arg9: memref<1x16xf32, #tpu.memory_space<vmem>>, %arg10: memref<8x16xf32, #tpu.memory_space<vmem>>) attributes {dimension_semantics = [#tpu.dimension_semantics<parallel>], iteration_bounds = array<i64: 1>, scalar_prefetch = 0 : i64, scratch_operands = 0 : i64, tpu.core_type = #tpu.core_type<tc>, window_params = [{transform_indices = @transform_0, window_bounds = array<i64: 8, 16>}, {pipeline_mode = #tpu.pipeline_mode<synchronous>, transform_indices = @transform_1, window_bounds = array<i64: 16, 32>}, {pipeline_mode = #tpu.pipeline_mode<synchronous>, transform_indices = @transform_2, window_bounds = array<i64: 1, 32>}, {pipeline_mode = #tpu.pipeline_mode<synchronous>, transform_indices = @transform_3, window_bounds = array<i64: 32, 32>}, {pipeline_mode = #tpu.pipeline_mode<synchronous>, transform_indices = @transform_4, window_bounds = array<i64: 1, 32>}, {pipeline_mode = #tpu.pipeline_mode<synchronous>, transform_indices = @transform_5, window_bounds = array<i64: 32, 32>}, {pipeline_mode = #tpu.pipeline_mode<synchronous>, transform_indices = @transform_6, window_bounds = array<i64: 1, 32>}, {pipeline_mode = #tpu.pipeline_mode<synchronous>, transform_indices = @transform_7, window_bounds = array<i64: 32, 16>}, {pipeline_mode = #tpu.pipeline_mode<synchronous>, transform_indices = @transform_8, window_bounds = array<i64: 1, 16>}, {transform_indices = @transform_9, window_bounds = array<i64: 8, 16>}]} {
    %c0 = arith.constant 0 : index
    %c0_0 = arith.constant 0 : index
    %0 = vector.load %arg1[%c0, %c0_0] : memref<8x16xf32, #tpu.memory_space<vmem>>, vector<8x16xf32>
    %c0_1 = arith.constant 0 : index
    %c0_2 = arith.constant 0 : index
    %1 = vector.load %arg2[%c0_1, %c0_2] : memref<16x32xf32, #tpu.memory_space<vmem>>, vector<16x32xf32>
    %cst = arith.constant dense<0.000000e+00> : vector<8x32xf32>
    %2 = tpu.matmul %0, %1, %cst {dimension_numbers = #tpu.dot_dimension_numbers<[1], [0], [0], [1], [0, 0, 1, 1], [], []>} : vector<8x16xf32>, vector<16x32xf32>, vector<8x32xf32> -> vector<8x32xf32>
    %c0_3 = arith.constant 0 : index
    %c0_4 = arith.constant 0 : index
    %3 = vector.load %arg3[%c0_3, %c0_4] : memref<1x32xf32, #tpu.memory_space<vmem>>, vector<1x32xf32>
    %4 = vector.broadcast %3 : vector<1x32xf32> to vector<8x32xf32>
    %5 = arith.addf %2, %4 : vector<8x32xf32>
    %cst_5 = arith.constant 0.000000e+00 : f32
    %6 = vector.broadcast %cst_5 : f32 to vector<8x32xf32>
    %7 = arith.cmpf ogt, %5, %6 : vector<8x32xf32>
    %cst_6 = arith.constant 2.000000e-01 : f32
    %8 = vector.broadcast %cst_6 : f32 to vector<8x32xf32>
    %9 = arith.mulf %8, %5 : vector<8x32xf32>
    %10 = arith.select %7, %5, %9 : vector<8x32xi1>, vector<8x32xf32>
    %c0_7 = arith.constant 0 : index
    %c0_8 = arith.constant 0 : index
    %11 = vector.load %arg4[%c0_7, %c0_8] : memref<32x32xf32, #tpu.memory_space<vmem>>, vector<32x32xf32>
    %cst_9 = arith.constant dense<0.000000e+00> : vector<8x32xf32>
    %12 = tpu.matmul %10, %11, %cst_9 {dimension_numbers = #tpu.dot_dimension_numbers<[1], [0], [0], [1], [0, 0, 1, 1], [], []>} : vector<8x32xf32>, vector<32x32xf32>, vector<8x32xf32> -> vector<8x32xf32>
    %c0_10 = arith.constant 0 : index
    %c0_11 = arith.constant 0 : index
    %13 = vector.load %arg5[%c0_10, %c0_11] : memref<1x32xf32, #tpu.memory_space<vmem>>, vector<1x32xf32>
    %14 = vector.broadcast %13 : vector<1x32xf32> to vector<8x32xf32>
    %15 = arith.addf %12, %14 : vector<8x32xf32>
    %cst_12 = arith.constant 0.000000e+00 : f32
    %16 = vector.broadcast %cst_12 : f32 to vector<8x32xf32>
    %17 = arith.cmpf ogt, %15, %16 : vector<8x32xf32>
    %cst_13 = arith.constant 2.000000e-01 : f32
    %18 = vector.broadcast %cst_13 : f32 to vector<8x32xf32>
    %19 = arith.mulf %18, %15 : vector<8x32xf32>
    %20 = arith.select %17, %15, %19 : vector<8x32xi1>, vector<8x32xf32>
    %c0_14 = arith.constant 0 : index
    %c0_15 = arith.constant 0 : index
    %21 = vector.load %arg6[%c0_14, %c0_15] : memref<32x32xf32, #tpu.memory_space<vmem>>, vector<32x32xf32>
    %cst_16 = arith.constant dense<0.000000e+00> : vector<8x32xf32>
    %22 = tpu.matmul %20, %21, %cst_16 {dimension_numbers = #tpu.dot_dimension_numbers<[1], [0], [0], [1], [0, 0, 1, 1], [], []>} : vector<8x32xf32>, vector<32x32xf32>, vector<8x32xf32> -> vector<8x32xf32>
    %c0_17 = arith.constant 0 : index
    %c0_18 = arith.constant 0 : index
    %23 = vector.load %arg7[%c0_17, %c0_18] : memref<1x32xf32, #tpu.memory_space<vmem>>, vector<1x32xf32>
    %24 = vector.broadcast %23 : vector<1x32xf32> to vector<8x32xf32>
    %25 = arith.addf %22, %24 : vector<8x32xf32>
    %cst_19 = arith.constant 0.000000e+00 : f32
    %26 = vector.broadcast %cst_19 : f32 to vector<8x32xf32>
    %27 = arith.cmpf ogt, %25, %26 : vector<8x32xf32>
    %cst_20 = arith.constant 2.000000e-01 : f32
    %28 = vector.broadcast %cst_20 : f32 to vector<8x32xf32>
    %29 = arith.mulf %28, %25 : vector<8x32xf32>
    %30 = arith.select %27, %25, %29 : vector<8x32xi1>, vector<8x32xf32>
    %c0_21 = arith.constant 0 : index
    %c0_22 = arith.constant 0 : index
    %31 = vector.load %arg8[%c0_21, %c0_22] : memref<32x16xf32, #tpu.memory_space<vmem>>, vector<32x16xf32>
    %cst_23 = arith.constant dense<0.000000e+00> : vector<8x16xf32>
    %32 = tpu.matmul %30, %31, %cst_23 {dimension_numbers = #tpu.dot_dimension_numbers<[1], [0], [0], [1], [0, 0, 1, 1], [], []>} : vector<8x32xf32>, vector<32x16xf32>, vector<8x16xf32> -> vector<8x16xf32>
    %c0_24 = arith.constant 0 : index
    %c0_25 = arith.constant 0 : index
    %33 = vector.load %arg9[%c0_24, %c0_25] : memref<1x16xf32, #tpu.memory_space<vmem>>, vector<1x16xf32>
    %34 = vector.broadcast %33 : vector<1x16xf32> to vector<8x16xf32>
    %35 = arith.addf %32, %34 : vector<8x16xf32>
    %c0_26 = arith.constant 0 : index
    %c0_27 = arith.constant 0 : index
    %36 = vector.load %arg10[%c0_26, %c0_27] : memref<8x16xf32, #tpu.memory_space<vmem>>, vector<8x16xf32>
    tpu.vector_store %arg10[%c0_26, %c0_27], %35 {strides = array<i32>} : memref<8x16xf32, #tpu.memory_space<vmem>>, vector<8x16xf32>,
    return
  }
  func.func @transform_0(%arg0: i32) -> (i32, i32) {
    %c0_i32 = arith.constant 0 : i32
    %c0_i32_0 = arith.constant 0 : i32
    return %arg0, %c0_i32 : i32, i32
  }
  func.func @transform_1(%arg0: i32) -> (i32, i32) {
    %c0_i32 = arith.constant 0 : i32
    %c0_i32_0 = arith.constant 0 : i32
    %c0_i32_1 = arith.constant 0 : i32
    return %c0_i32, %c0_i32_0 : i32, i32
  }
  func.func @transform_2(%arg0: i32) -> (i32, i32) {
    %c0_i32 = arith.constant 0 : i32
    %c0_i32_0 = arith.constant 0 : i32
    %c0_i32_1 = arith.constant 0 : i32
    return %c0_i32, %c0_i32_0 : i32, i32
  }
  func.func @transform_3(%arg0: i32) -> (i32, i32) {
    %c0_i32 = arith.constant 0 : i32
    %c0_i32_0 = arith.constant 0 : i32
    %c0_i32_1 = arith.constant 0 : i32
    return %c0_i32, %c0_i32_0 : i32, i32
  }
  func.func @transform_4(%arg0: i32) -> (i32, i32) {
    %c0_i32 = arith.constant 0 : i32
    %c0_i32_0 = arith.constant 0 : i32
    %c0_i32_1 = arith.constant 0 : i32
    return %c0_i32, %c0_i32_0 : i32, i32
  }
  func.func @transform_5(%arg0: i32) -> (i32, i32) {
    %c0_i32 = arith.constant 0 : i32
    %c0_i32_0 = arith.constant 0 : i32
    %c0_i32_1 = arith.constant 0 : i32
    return %c0_i32, %c0_i32_0 : i32, i32
  }
  func.func @transform_6(%arg0: i32) -> (i32, i32) {
    %c0_i32 = arith.constant 0 : i32
    %c0_i32_0 = arith.constant 0 : i32
    %c0_i32_1 = arith.constant 0 : i32
    return %c0_i32, %c0_i32_0 : i32, i32
  }
  func.func @transform_7(%arg0: i32) -> (i32, i32) {
    %c0_i32 = arith.constant 0 : i32
    %c0_i32_0 = arith.constant 0 : i32
    %c0_i32_1 = arith.constant 0 : i32
    return %c0_i32, %c0_i32_0 : i32, i32
  }
  func.func @transform_8(%arg0: i32) -> (i32, i32) {
    %c0_i32 = arith.constant 0 : i32
    %c0_i32_0 = arith.constant 0 : i32
    %c0_i32_1 = arith.constant 0 : i32
    return %c0_i32, %c0_i32_0 : i32, i32
  }
  func.func @transform_9(%arg0: i32) -> (i32, i32) {
    %c0_i32 = arith.constant 0 : i32
    %c0_i32_0 = arith.constant 0 : i32
    return %arg0, %c0_i32 : i32, i32
  }
}

</mosaic_0001>

<bundles_post_ra>
// kernel: encoder_forward.1
= control target key start
LH: loop header
LB: loop body
LE: loop exit
PB: predicated region body
PF: predicated region fallthrough
CT: control target
= control target key end

     0   :  { %14 = vsyncpa [#allocation3], 0  ;;  %s786_s0 = inlined_call_operand.hbm [shape: f32[8,16], index: 0, kind: input, shape index: {}]   ;;  %s787_s1 = inlined_call_operand.hbm [shape: f32[16,32], index: 1, kind: input, shape index: {}]   ;;  %s788_s2 = inlined_call_operand.vmem [shape: f32[1,32], index: 2, kind: input, shape index: {}]   ;;  %s789_s3 = inlined_call_operand.vmem [shape: f32[32,32], index: 3, kind: input, shape index: {}]   ;;  %s790_s4 = inlined_call_operand.vmem [shape: f32[1,32], index: 4, kind: input, shape index: {}]   ;;  %s791_s5 = inlined_call_operand.vmem [shape: f32[32,32], index: 5, kind: input, shape index: {}]   ;;  %s792_s6 = inlined_call_operand.hbm [shape: f32[1,32], index: 6, kind: input, shape index: {}]   ;;  %s793_s7 = inlined_call_operand.vmem [shape: f32[32,16], index: 7, kind: input, shape index: {}]   ;;  %s794_s8 = inlined_call_operand.hbm [shape: f32[1,16], index: 8, kind: input, shape index: {}]   ;;  %s795_s9 = inlined_call_operand.vmem [shape: f32[8,16], index: 9, kind: output, shape index: {}]  }
   0x1   :  { %15 = vsyncpa [#allocation5], 0 }
   0x2   :  { %16 = vsyncpa [#allocation8], 0  ;;  %s625_s30 = smov [#allocation4]   ;;  %s531_s13 = scalar_lea.hbm %s787_s1, 256 }
   0x3   :  { %s32_s10 = sshll.u32 %s625_s30, 4  ;;  %p532_p0 = scmp.ne.s32.totalorder %s787_s1, %s531_s13  ;;  %s33_s10 = int_to_ptr.vmem [resolvable:$true] %s32_s10 }
   0x4   :  { %p535_p1 = scmp.lt.u32.totalorder %s531_s13, %s787_s1 }
   0x6   :  { %p537_p2 = pnand %p535_p1, %p532_p0 }
   0x8   :  { %540 = shalt.err (!%p537_p2)
}
   0x9   :  { %s541_s18 = scalar_lea.vmem %s33_s10, 256  ;;  %p546_p4 = scmp.lt.s32.totalorder %s33_s10, %s33_s10 }
   0xa   :  { %p542_p3 = scmp.ne.s32.totalorder %s33_s10, %s541_s18  ;;  %p547_p5 = scmp.lt.s32.totalorder %s541_s18, %s541_s18 }
   0xc   :  { %p548_p6 = por %p547_p5, %p546_p4 }
   0xe   :  { %p549_p7 = pnand %p548_p6, %p542_p3 }
  0x10   :  { %552 = shalt.err (!%p549_p7)
}
  0x11   :  { %s626_s19 = smov 128   ;;  %s627_s20 = smov 8  }
  0x12   :  { %38 = dma.hbm_to_vmem [thread:$0]  %s787_s1, 256, %s33_s10, [#allocation5], %s626_s19, %s626_s19, %s627_s20  }
  0x13   :  { %s628_s23 = smov [#allocation2]   ;;  %s629_s25 = smov [#allocation6]  }
  0x14   :  { %s23_s24 = sshll.u32 %s628_s23, 4  ;;  %s53_s26 = sshll.u32 %s629_s25, 4  ;;  %s24_s24 = int_to_ptr.vmem [resolvable:$true] %s23_s24  ;;  %s54_s26 = int_to_ptr.vmem [resolvable:$true] %s53_s26 }
  0x15   :  { %s553_s29 = scalar_lea.hbm %s786_s0, 128 }
  0x16   :  { %p554_p8 = scmp.ne.s32.totalorder %s786_s0, %s553_s29  ;;  %p557_p9 = scmp.lt.u32.totalorder %s553_s29, %s786_s0 }
  0x18   :  { %p559_p10 = pnand %p557_p9, %p554_p8 }
  0x1a   :  { %562 = shalt.err (!%p559_p10)
}
  0x1b   :  { %s563_s1 = scalar_lea.vmem %s24_s24, 128  ;;  %p568_p12 = scmp.lt.s32.totalorder %s24_s24, %s24_s24 }
  0x1c   :  { %p564_p11 = scmp.ne.s32.totalorder %s24_s24, %s563_s1  ;;  %p569_p13 = scmp.lt.s32.totalorder %s563_s1, %s563_s1 }
  0x1e   :  { %p570_p0 = por %p569_p13, %p568_p12 }
  0x20   :  { %p571_p1 = pnand %p570_p0, %p564_p11 }
  0x22   :  { %574 = shalt.err (!%p571_p1)
}
  0x23   :  { %26 = dma.hbm_to_vmem [thread:$0]  %s786_s0, 128, %s24_s24, [#allocation3]  }
  0x24   :  { %s575_s17 = scalar_lea.hbm %s792_s6, 16 }
  0x25   :  { %p576_p2 = scmp.ne.s32.totalorder %s792_s6, %s575_s17  ;;  %p579_p3 = scmp.lt.u32.totalorder %s575_s17, %s792_s6 }
  0x27   :  { %p581_p4 = pnand %p579_p3, %p576_p2 }
  0x29   :  { %584 = shalt.err (!%p581_p4)
}
  0x2a   :  { %s585_s22 = scalar_lea.vmem %s54_s26, 16  ;;  %s589_s23 = scalar_lea.vmem %s54_s26, 32 }
  0x2b   :  { %p586_p5 = scmp.ne.s32.totalorder %s54_s26, %s585_s22  ;;  %p590_p6 = scmp.lt.s32.totalorder %s54_s26, %s54_s26 }
  0x2c   :  { %p591_p7 = scmp.lt.s32.totalorder %s589_s23, %s585_s22 }
  0x2e   :  { %p592_p8 = por %p591_p7, %p590_p6 }
  0x30   :  { %p593_p9 = pnand %p592_p8, %p586_p5 }
  0x32   :  { %596 = shalt.err (!%p593_p9)
}
  0x33   :  { %56 = dma.hbm_to_vmem [thread:$0]  %s792_s6, 16, %s54_s26, [#allocation5]  }
  0x34   :  { %s630_s25 = smov [#allocation7]   ;;  %s597_s30 = scalar_lea.hbm %s794_s8, 16 }
  0x35   :  { %s65_s27 = sshll.u32 %s630_s25, 4  ;;  %p598_p10 = scmp.ne.s32.totalorder %s794_s8, %s597_s30  ;;  %s66_s27 = int_to_ptr.vmem [resolvable:$true] %s65_s27 }
  0x36   :  { %p601_p11 = scmp.lt.u32.totalorder %s597_s30, %s794_s8 }
  0x38   :  { %p603_p12 = pnand %p601_p11, %p598_p10 }
  0x3a   :  { %606 = shalt.err (!%p603_p12)
}
  0x3b   :  { %s607_s10 = scalar_lea.vmem %s66_s27, 16  ;;  %s611_s6 = scalar_lea.vmem %s66_s27, 32 }
  0x3c   :  { %p608_p13 = scmp.ne.s32.totalorder %s66_s27, %s607_s10  ;;  %p612_p0 = scmp.lt.s32.totalorder %s66_s27, %s66_s27 }
  0x3d   :  { %p613_p1 = scmp.lt.s32.totalorder %s611_s6, %s607_s10 }
  0x3f   :  { %p614_p2 = por %p613_p1, %p612_p0 }
  0x41   :  { %p615_p3 = pnand %p614_p2, %p608_p13 }
  0x43   :  { %618 = shalt.err (!%p615_p3)
}
  0x44   :  { %68 = dma.hbm_to_vmem [thread:$0]  %s794_s8, 16, %s66_s27, [#allocation8]  }
  0x45   :  { %619 = dma.done.wait [#allocation3], 128  }
  0x46   :  { %620 = vsyncadd [#allocation3], 4294967168 }
  0x47   :  { %621 = dma.done.wait [#allocation5], 272  }
  0x48   :  { %622 = vsyncadd [#allocation5], 4294967024 }
  0x49   :  { %623 = dma.done.wait [#allocation8], 16  }
  0x4a   :  { %624 = vsyncadd [#allocation8], 4294967280  ;;  %v631_v0 = vmov 0.0|0.0   ;;  %vm632_vm0 = vmmov 0   ;;  %v633_v1 = vmov 0.0   ;;  %v82_v2 = vld [vmem:[#allocation4] sm:$0xff] }
  0x4b   :  { %501 = vmatprep.subr.bf16.mxu0 %v631_v0  ;;  %465 = vmatprep.mubr.msk.f32.mxu0 %vm632_vm0, %v633_v1  ;;  %v83_v3 = vld [vmem:[#allocation4 + $0x8] sm:$0xff]  ;;  %v168_v5 = vld [vmem:[%s789_s3] sm:$0xff]  ;;  %v169_v6 = vld [vmem:[%s789_s3 + $0x8] sm:$0xff]  ;;  %vm91_vm1 = vcmask 130048   ;;  %vm179_vm3 = vcmask 261120  }
  0x4c   :  { %504 = vmatprep.subr.bf16.mxu1 %v631_v0  ;;  %476 = vmatprep.mubr.msk.f32.mxu1 %vm632_vm0, %v633_v1  ;;  %v502_v4 = vpack.c.bf16 %v83_v3, %v82_v2  ;;  %v505_v7 = vpack.c.bf16 %v169_v6, %v168_v5  ;;  %v81_v8 = vld [vmem:[#allocation2] sm:$0xff]  ;;  %v170_v9 = vld [vmem:[%s789_s3 + $0x10] sm:$0xff]  ;;  %v171_v10 = vld [vmem:[%s789_s3 + $0x18] sm:$0xff] }
  0x4d   :  { %v508_v11 = vpack.c.bf16 %v171_v10, %v170_v9  ;;  %v256_v12 = vld [vmem:[%s791_s5] sm:$0xff]  ;;  %v257_v13 = vld [vmem:[%s791_s5 + $0x8] sm:$0xff]  ;;  %v258_v21 = vld [vmem:[%s791_s5 + $0x10] sm:$0xff] }
  0x4e   :  { %503 = vmatpush3.bf16.msra.mxu0 %v502_v4  ;;  %506 = vmatpush3.bf16.msra.mxu1 %v505_v7  ;;  %v511_v14 = vpack.c.bf16 %v257_v13, %v256_v12  ;;  %v435_v15 = vld [vmem:[%s788_s2] ss:$0 sm:$0xff]  ;;  %v259_v22 = vld [vmem:[%s791_s5 + $0x18] sm:$0xff]  ;;  %v344_v25 = vld [vmem:[%s793_s7 + $0x8] sm:$0xff] }
  0x4f   :  { %510 = vmatprep.subr.bf16.mxu0 %v631_v0  ;;  %507 = vmatprep.subr.bf16.mxu1 %v631_v0  ;;  %v514_v23 = vpack.c.bf16 %v259_v22, %v258_v21  ;;  %v343_v24 = vld [vmem:[%s793_s7] sm:$0xff]  ;;  %v345_v33 = vld [vmem:[%s793_s7 + $0x10] sm:$0xff]  ;;  %v346_v34 = vld [vmem:[%s793_s7 + $0x18] sm:$0xff] }
  0x50   :  { %v517_v26 = vpack.c.bf16 %v344_v25, %v343_v24  ;;  %v437_v27 = vld [vmem:[%s790_s4] ss:$0 sm:$0xff]  ;;  %v520_v35 = vpack.c.bf16 %v346_v34, %v345_v33  ;;  %v439_v36 = vld [vmem:[#allocation6] ss:$0 sm:$0xff]  ;;  %v441_v42 = vld [vmem:[#allocation7] ss:$0 sm:$0xff] }
  0x51   :  { %466 = vmatmul.mubr.msk.f32.vlgmr.msra.gmra.mrb[0].mxu0 %vm91_vm1, %v81_v8 }
  0x52   :  { %487 = vmatprep.mubr.msk.f32.mxu0 %vm632_vm0, %v633_v1  ;;  %509 = vmatpush3.bf16.msra.mxu1 %v508_v11 }
  0x53   :  { %516 = vmatprep.subr.bf16.mxu1 %v631_v0  ;;  %512 = vmatpush3.bf16.msra.mxu0 %v511_v14 }
  0x54   :  { %513 = vmatprep.subr.bf16.mxu0 %v631_v0 }
  0x57   :  { %515 = vmatpush3.bf16.msra.mxu0 %v514_v23 }
 0x124   :  { %v161_v16 = vpop.f32.mrb[0].mxu0 }
 0x125   :  { %v162_v17 = vadd.f32 %v435_v15, %v161_v16  ;;  %v467_v18 = vpop.f32.mrb[1].mxu0 }
 0x127   :  { %vm165_vm2 = vcmp.gt.f32.partialorder %v162_v17, 0.0  ;;  %v166_v19 = vmul.f32 0.2, %v162_v17 }
 0x129   :  { %v167_v20 = vsel %vm165_vm2, %v162_v17, %v166_v19 }
 0x12a   :  { %477 = vmatmul.mubr.msk.f32.vlgmr.msra.gmra.mrb[0].mxu1 %vm179_vm3, %v167_v20 }
 0x12b   :  { %498 = vmatprep.mubr.msk.f32.mxu1 %vm632_vm0, %v633_v1  ;;  %518 = vmatpush3.bf16.msra.mxu1 %v517_v26 }
 0x12c   :  { %519 = vmatprep.subr.bf16.mxu1 %v631_v0 }
 0x12f   :  { %521 = vmatpush3.bf16.msra.mxu1 %v520_v35 }
 0x1fd   :  { %v249_v28 = vpop.f32.mrb[0].mxu1 }
 0x1fe   :  { %v250_v29 = vadd.f32 %v437_v27, %v249_v28  ;;  %v478_v30 = vpop.f32.mrb[1].mxu1 }
 0x200   :  { %vm253_vm4 = vcmp.gt.f32.partialorder %v250_v29, 0.0  ;;  %v254_v31 = vmul.f32 0.2, %v250_v29 }
 0x202   :  { %v255_v32 = vsel %vm253_vm4, %v250_v29, %v254_v31 }
 0x203   :  { %488 = vmatmul.mubr.msk.f32.vlgmr.msra.gmra.mrb[2].mxu0 %vm179_vm3, %v255_v32 }
 0x2d6   :  { %v336_v37 = vpop.f32.mrb[2].mxu0 }
 0x2d7   :  { %v337_v38 = vadd.f32 %v439_v36, %v336_v37  ;;  %v489_v39 = vpop.f32.mrb[3].mxu0 }
 0x2d9   :  { %vm340_vm5 = vcmp.gt.f32.partialorder %v337_v38, 0.0  ;;  %v341_v40 = vmul.f32 0.2, %v337_v38 }
 0x2db   :  { %v342_v41 = vsel %vm340_vm5, %v337_v38, %v341_v40 }
 0x2dc   :  { %499 = vmatmul.mubr.msk.f32.vlgmr.msra.gmra.mrb[2].mxu1 %vm179_vm3, %v342_v41 }
 0x3af   :  { %v423_v43 = vpop.f32.mrb[2].mxu1 }
 0x3b0   :  { %v424_v44 = vadd.f32 %v441_v42, %v423_v43  ;;  %v500_v45 = vpop.f32.mrb[3].mxu1 }
 0x3b2   :  { %427 = vst.msk [vmem:[%s795_s9] sm:$0xff] %vm91_vm1, %v424_v44 }
 0x3b3   :  { %432 = vsyncpa [#allocation3], 1 }
 0x3b4   :  { %433 = vsyncpa [#allocation5], 1 }
 0x3b5   :  { %434 = vsyncpa [#allocation8], 1 }

</bundles_post_ra>
